<compile_context>
chip_gen: v5e
topology: v5e:2x2
jax: 0.10.0
libtpu: 0.0.40
codegen_flags: <defaults>
</compile_context>

<pallas_src>
import functools

import jax
import jax.numpy as jnp
from jax.experimental import pallas as pl
from jax.experimental.pallas import tpu as pltpu

LEAKY_SLOPE = 0.01   # nn.LeakyReLU() default
BN_EPS = 1e-5
KSIZE = 3
STRIDE = 2


def _round_up(x, m):
    return ((x + m - 1) // m) * m


# --------------------------------------------------------------------------
# Kernel 1: full-K matmul fused with bias add + activation (no K grid axis)
# --------------------------------------------------------------------------
def _fused_matmul_kernel(p_ref, w_ref, b_ref, o_ref, *, act):
    y = jnp.dot(p_ref[...], w_ref[...], preferred_element_type=jnp.float32)
    y = y + b_ref[...]                       # (tm, tn) + (1, tn)
    if act == "leaky":
        y = jnp.where(y >= 0, y, LEAKY_SLOPE * y)
    elif act == "tanh":
        y = jnp.tanh(y)
    o_ref[...] = y.astype(o_ref.dtype)


def _choose_tiles(M, N):
    """Per-layer tile sizes; always leaves >=2 grid blocks for v7x megacore."""
    tm = min(_round_up(M, 16), 256)          # 16-aligned (bf16 sublane packing)
    Np = _round_up(N, 128)
    m_blocks = pl.cdiv(M, tm)
    if m_blocks >= 2 or Np < 256:
        tn = min(Np, 256)
    else:
        # single M block: split N so both TensorCores get work on v7x
        tn = 256 if Np >= 512 else 128
    return tm, tn, Np


def fused_matmul(patches, weight, bias, act):
    """patches (M,K) @ weight (K,N) + bias (N,), activation -> (M,N) f32."""
    M, K = patches.shape
    _, N = weight.shape
    tm, tn, Np = _choose_tiles(M, N)
    Mp = _round_up(M, tm)
    Kp = _round_up(K, 128)

    pp = jnp.pad(patches, ((0, Mp - M), (0, Kp - K))).astype(jnp.bfloat16)
    wp = jnp.pad(weight, ((0, Kp - K), (0, Np - N))).astype(jnp.bfloat16)
    bp = jnp.pad(bias, (0, Np - N)).reshape(1, Np).astype(jnp.float32)

    out = pl.pallas_call(
        functools.partial(_fused_matmul_kernel, act=act),
        out_shape=jax.ShapeDtypeStruct((Mp, Np), jnp.float32),
        grid_spec=pltpu.PrefetchScalarGridSpec(
            num_scalar_prefetch=0,
            grid=(Mp // tm, Np // tn),
            in_specs=[
                pl.BlockSpec((tm, Kp), lambda i, j: (i, 0)),
                pl.BlockSpec((Kp, tn), lambda i, j: (0, j)),
                pl.BlockSpec((1, tn), lambda i, j: (0, j)),
            ],
            out_specs=pl.BlockSpec((tm, tn), lambda i, j: (i, j)),
        ),
        compiler_params=pltpu.CompilerParams(
            dimension_semantics=("parallel", "parallel")),
    )(pp, wp, bp)
    return out[:M, :N]


# --------------------------------------------------------------------------
# Kernel 2: mat-vec (Cout = 1) + tanh on the VPU — avoids padded-N MXU waste
# --------------------------------------------------------------------------
def _matvec_tanh_kernel(p_ref, w_ref, b_ref, o_ref):
    prod = p_ref[...] * w_ref[...]                      # (tm, Kp) * (1, Kp)
    s = jnp.sum(prod, axis=-1, keepdims=True)           # (tm, 1)
    o_ref[...] = jnp.tanh(s + b_ref[...]).astype(o_ref.dtype)


def matvec_tanh(patches, wvec, bias, tm=128):
    """tanh(patches (M,K) @ wvec (K,) + bias) -> (M, 1) f32."""
    M, K = patches.shape
    Mp = _round_up(M, tm)
    Kp = _round_up(K, 128)
    pp = jnp.pad(patches, ((0, Mp - M), (0, Kp - K))).astype(jnp.float32)
    wp = jnp.pad(wvec, (0, Kp - K)).reshape(1, Kp).astype(jnp.float32)
    bp = jnp.reshape(bias, (1, 1)).astype(jnp.float32)

    out = pl.pallas_call(
        _matvec_tanh_kernel,
        out_shape=jax.ShapeDtypeStruct((Mp, 1), jnp.float32),
        grid_spec=pltpu.PrefetchScalarGridSpec(
            num_scalar_prefetch=0,
            grid=(Mp // tm,),
            in_specs=[
                pl.BlockSpec((tm, Kp), lambda i: (i, 0)),
                pl.BlockSpec((1, Kp), lambda i: (0, 0)),
                pl.BlockSpec((1, 1), lambda i: (0, 0)),
            ],
            out_specs=pl.BlockSpec((tm, 1), lambda i: (i, 0)),
        ),
        compiler_params=pltpu.CompilerParams(
            dimension_semantics=("parallel",)),
    )(pp, wp, bp)
    return out[:M, :]


# --------------------------------------------------------------------------
# Glue: im2col / dilation / weight reshaping / BN folding (plain JAX)
# --------------------------------------------------------------------------
def _im2col(x, k, s):
    """x: (N, H, W, C) -> patches (N*OH*OW, k*k*C), plus output spatial shape."""
    n, h, w, c = x.shape
    oh = (h - k) // s + 1
    ow = (w - k) // s + 1
    cols = []
    for kh in range(k):
        for kw in range(k):
            cols.append(x[:, kh:kh + s * (oh - 1) + 1:s,
                          kw:kw + s * (ow - 1) + 1:s, :])
    patches = jnp.concatenate(cols, axis=-1)          # (N, OH, OW, k*k*C)
    return patches.reshape(n * oh * ow, k * k * c), (n, oh, ow)


def _fold_bn(conv_bias, gamma, beta):
    # eval-mode BN with running_mean=0, running_var=1
    scale = gamma / jnp.sqrt(1.0 + BN_EPS)
    bias = conv_bias * scale + beta
    return scale, bias


def conv_bn_lrelu(x, w, b, gamma, beta):
    """Conv2d(k=3, s=2, pad=0) + BatchNorm2d(eval) + LeakyReLU.  x: NHWC."""
    cout, cin = w.shape[0], w.shape[1]
    patches, (n, oh, ow) = _im2col(x, KSIZE, STRIDE)
    w2 = jnp.transpose(w, (2, 3, 1, 0)).reshape(KSIZE * KSIZE * cin, cout)
    scale, bias = _fold_bn(b, gamma, beta)
    out = fused_matmul(patches, w2 * scale[None, :], bias, act="leaky")
    return out.reshape(n, oh, ow, cout)


def _deconv_patches(x, output_padding):
    """Dilate + pad so ConvTranspose2d(k=3,s=2) becomes a stride-1 conv."""
    n, h, w, c = x.shape
    hd, wd = (h - 1) * STRIDE + 1, (w - 1) * STRIDE + 1
    xd = jnp.zeros((n, hd, wd, c), x.dtype).at[:, ::STRIDE, ::STRIDE, :].set(x)
    p0 = KSIZE - 1
    p1 = KSIZE - 1 + output_padding
    xp = jnp.pad(xd, ((0, 0), (p0, p1), (p0, p1), (0, 0)))
    return _im2col(xp, KSIZE, 1)


def _deconv_weight(wt):
    """PyTorch ConvTranspose2d weight (Cin, Cout, kH, kW) -> (k*k*Cin, Cout)."""
    cin, cout = wt.shape[0], wt.shape[1]
    w_eq = jnp.flip(wt, axis=(2, 3)).transpose(2, 3, 0, 1)   # (kh, kw, cin, cout)
    return w_eq.reshape(KSIZE * KSIZE * cin, cout)


def deconv_bn_lrelu(x, wt, b, gamma, beta):
    """ConvTranspose2d(k=3,s=2) + BatchNorm2d(eval) + Dropout(id) + LeakyReLU."""
    cout = wt.shape[1]
    patches, (n, oh, ow) = _deconv_patches(x, output_padding=0)
    scale, bias = _fold_bn(b, gamma, beta)
    out = fused_matmul(patches, _deconv_weight(wt) * scale[None, :], bias,
                       act="leaky")
    return out.reshape(n, oh, ow, cout)


def deconv_tanh(x, wt, b):
    """ConvTranspose2d(k=3,s=2,output_padding=1) + Tanh (Cout = 1)."""
    patches, (n, oh, ow) = _deconv_patches(x, output_padding=1)
    wcol = _deconv_weight(wt)[:, 0]           # (k*k*Cin,)
    out = matvec_tanh(patches, wcol, b[0])
    return out.reshape(n, oh, ow, 1)


# --------------------------------------------------------------------------
# Parameters (deterministic synthetic init; shapes from G.__init__)
# --------------------------------------------------------------------------
ENC_DIMS = [(1, 64), (64, 256), (256, 512), (512, 512)]
DEC_DIMS = [(512, 512), (512, 256), (256, 64)]


def init_params(key):
    keys = jax.random.split(key, 16)
    ki = 0
    enc, dec = [], []
    for ci, co in ENC_DIMS:
        w = 0.02 * jax.random.normal(keys[ki], (co, ci, KSIZE, KSIZE), jnp.float32); ki += 1
        b = 0.02 * jax.random.normal(keys[ki], (co,), jnp.float32); ki += 1
        enc.append((w, b, jnp.ones((co,), jnp.float32), jnp.zeros((co,), jnp.float32)))
    for ci, co in DEC_DIMS:
        w = 0.02 * jax.random.normal(keys[ki], (ci, co, KSIZE, KSIZE), jnp.float32); ki += 1
        b = 0.02 * jax.random.normal(keys[ki], (co,), jnp.float32); ki += 1
        dec.append((w, b, jnp.ones((co,), jnp.float32), jnp.zeros((co,), jnp.float32)))
    w8 = 0.02 * jax.random.normal(keys[ki], (64, 1, KSIZE, KSIZE), jnp.float32); ki += 1
    b8 = 0.02 * jax.random.normal(keys[ki], (1,), jnp.float32)
    return {"enc": enc, "dec": dec, "final": (w8, b8)}


# --------------------------------------------------------------------------
# Full forward pass of G
# --------------------------------------------------------------------------
def generator_forward(x_nchw, labels, params, in_channels=1, out_channels=1,
                      input_size=32):
    # assert_size(x, in_channels, input_size)
    assert x_nchw.shape[1:] == (in_channels, input_size, input_size)
    del labels  # unused in the reference forward()

    x = jnp.transpose(x_nchw, (0, 2, 3, 1)).astype(jnp.float32)  # -> NHWC
    for (w, b, g, be) in params["enc"]:
        x = conv_bn_lrelu(x, w, b, g, be)          # l1..l4 + LeakyReLU
    for (w, b, g, be) in params["dec"]:
        x = deconv_bn_lrelu(x, w, b, g, be)        # l5..l7 + LeakyReLU
    w8, b8 = params["final"]
    x = deconv_tanh(x, w8, b8)                     # l8 + Tanh

    out = jnp.transpose(x, (0, 3, 1, 2))           # back to NCHW
    # assert_size(output, out_channels, input_size)
    assert out.shape[1:] == (out_channels, input_size, input_size)
    return out


if __name__ == "__main__":
    key = jax.random.PRNGKey(0)
    kx, kl, kp = jax.random.split(key, 3)

    batch, in_ch, size = 2, 1, 32       # 32 round-trips the 4-down / 4-up stack
    x = jax.random.normal(kx, (batch, in_ch, size, size), jnp.float32)
    labels = jax.random.randint(kl, (batch,), 0, 10)   # unused, as in the module
    params = init_params(kp)

    out = generator_forward(x, labels, params, input_size=size)
    out = jax.block_until_ready(out)

    assert out.shape == (batch, 1, size, size)
    assert bool(jnp.all(jnp.isfinite(out)))
    assert bool(jnp.all(jnp.abs(out) <= 1.0 + 1e-6))   # tanh range
    print("KERNEL_OK")
</pallas_src>

<mosaic_0001>
module attributes {stable_mosaic.version = 11 : i64} {
  func.func @_fused_matmul_kernel(%arg0: i32, %arg1: i32, %arg2: memref<256x128xbf16, #tpu.memory_space<vmem>>, %arg3: memref<128x128xbf16, #tpu.memory_space<vmem>>, %arg4: memref<1x128xf32, #tpu.memory_space<vmem>>, %arg5: memref<256x128xf32, #tpu.memory_space<vmem>>) attributes {dimension_semantics = [#tpu.dimension_semantics<parallel>, #tpu.dimension_semantics<parallel>], iteration_bounds = array<i64: 2, 1>, scalar_prefetch = 0 : i64, scratch_operands = 0 : i64, tpu.core_type = #tpu.core_type<tc>, window_params = [{transform_indices = @transform_0, window_bounds = array<i64: 256, 128>}, {transform_indices = @transform_1, window_bounds = array<i64: 128, 128>}, {transform_indices = @transform_2, window_bounds = array<i64: 1, 128>}, {transform_indices = @transform_3, window_bounds = array<i64: 256, 128>}]} {
    %c0 = arith.constant 0 : index
    %c0_0 = arith.constant 0 : index
    %0 = vector.load %arg2[%c0, %c0_0] : memref<256x128xbf16, #tpu.memory_space<vmem>>, vector<256x128xbf16>
    %c0_1 = arith.constant 0 : index
    %c0_2 = arith.constant 0 : index
    %1 = vector.load %arg3[%c0_1, %c0_2] : memref<128x128xbf16, #tpu.memory_space<vmem>>, vector<128x128xbf16>
    %cst = arith.constant dense<0.000000e+00> : vector<256x128xf32>
    %2 = tpu.matmul %0, %1, %cst {dimension_numbers = #tpu.dot_dimension_numbers<[1], [0], [0], [1], [0, 0, 1, 1], [], []>} : vector<256x128xbf16>, vector<128x128xbf16>, vector<256x128xf32> -> vector<256x128xf32>
    %c0_3 = arith.constant 0 : index
    %c0_4 = arith.constant 0 : index
    %3 = vector.load %arg4[%c0_3, %c0_4] : memref<1x128xf32, #tpu.memory_space<vmem>>, vector<1x128xf32>
    %4 = vector.broadcast %3 : vector<1x128xf32> to vector<256x128xf32>
    %5 = arith.addf %2, %4 : vector<256x128xf32>
    %cst_5 = arith.constant 0.000000e+00 : f32
    %6 = vector.broadcast %cst_5 : f32 to vector<256x128xf32>
    %7 = arith.cmpf oge, %5, %6 : vector<256x128xf32>
    %cst_6 = arith.constant 0.00999999977 : f32
    %8 = vector.broadcast %cst_6 : f32 to vector<256x128xf32>
    %9 = arith.mulf %8, %5 : vector<256x128xf32>
    %10 = arith.select %7, %5, %9 : vector<256x128xi1>, vector<256x128xf32>
    %c0_7 = arith.constant 0 : index
    %c0_8 = arith.constant 0 : index
    %11 = vector.load %arg5[%c0_7, %c0_8] : memref<256x128xf32, #tpu.memory_space<vmem>>, vector<256x128xf32>
    tpu.vector_store %arg5[%c0_7, %c0_8], %10 {strides = array<i32>} : memref<256x128xf32, #tpu.memory_space<vmem>>, vector<256x128xf32>,
    return
  }
  func.func @transform_0(%arg0: i32, %arg1: i32) -> (i32, i32) {
    %c0_i32 = arith.constant 0 : i32
    %c0_i32_0 = arith.constant 0 : i32
    return %arg0, %c0_i32 : i32, i32
  }
  func.func @transform_1(%arg0: i32, %arg1: i32) -> (i32, i32) {
    %c0_i32 = arith.constant 0 : i32
    %c0_i32_0 = arith.constant 0 : i32
    return %c0_i32, %arg1 : i32, i32
  }
  func.func @transform_2(%arg0: i32, %arg1: i32) -> (i32, i32) {
    %c0_i32 = arith.constant 0 : i32
    %c0_i32_0 = arith.constant 0 : i32
    return %c0_i32, %arg1 : i32, i32
  }
  func.func @transform_3(%arg0: i32, %arg1: i32) -> (i32, i32) {
    %c0_i32 = arith.constant 0 : i32
    return %arg0, %arg1 : i32, i32
  }
}

</mosaic_0001>

<bundles_post_ra>
// kernel: tpu_custom_call.1
= control target key start
LH: loop header
LB: loop body
LE: loop exit
PB: predicated region body
PF: predicated region fallthrough
CT: control target
= control target key end

     0   :  { %s1443_s0 = inlined_call_operand.hbm [shape: bf16[512,128], index: 0, kind: input, shape index: {}]   ;;  %s1444_s1 = inlined_call_operand.hbm [shape: bf16[128,128], index: 1, kind: input, shape index: {}]   ;;  %s1445_s2 = inlined_call_operand.vmem [shape: f32[1,128], index: 2, kind: input, shape index: {}]   ;;  %s1446_s3 = inlined_call_operand.hbm [shape: f32[512,128], index: 3, kind: output, shape index: {}]  }
   0x1   :  { %1448 = sst [smem:[#allocation11_spill]] %s1444_s1 }
   0x2   :  { %8 = vsyncpa [#allocation3], 0 }
   0x3   :  { %10 = vsyncpa [#allocation3 + $0x1], 0 }
   0x4   :  { %11 = vsyncpa [#allocation6], 0 }
   0x5   :  { %12 = vsyncpa [#allocation4], 0 }
   0x6   :  { %14 = vsyncpa [#allocation4 + $0x1], 0  ;;  %s1197_s12 = smov 0   ;;  %s1199_s13 = smov 0  }
   0x7   :  { %s1201_s14 = smov 0   ;;  %s1203_s15 = smov 0  }
   0x8   :  { %s1205_s16 = smov 0   ;;  %s1207_s17 = smov 0  }
   0x9 LB: > { %s782_s18 = sadd.s32 4294967295, %s1170_s17   ;;  %s783_s19 = sadd.s32 4294967294, %s1170_s17   ;;  %s1170_s17 = sphi %s1207_s17, %s20_s17   ;;  %s1166_s16 = sphi %s1205_s16, %s1462_s16   ;;  %s1162_s15 = sphi %s1203_s15, %s1461_s15   ;;  %s1158_s14 = sphi %s1201_s14, %s1460_s14   ;;  %s1154_s13 = sphi %s1199_s13, %s1459_s13   ;;  %s1150_s12 = sphi %s1197_s12, %s1458_s12  }
   0xa   : > { %p52_p0 = scmp.ne.s32.totalorder %s1154_s13, %s1150_s12  ;;  %p1231_p1 = scmp.eq.s32.totalorder %s782_s18, 0 }
   0xb   : > { %p1235_p2 = scmp.eq.s32.totalorder %s782_s18, 1  ;;  %p136_p3 = scmp.eq.s32.totalorder %s783_s19, 1 }
   0xc   : > { %p1241_p4 = por %p1231_p1, %p52_p0  ;;  %p784_p5 = scmp.ge.s32.totalorder %s1170_s17, 1 }
   0xd   : > { %p1246_p6 = por %p136_p3, %p52_p0  ;;  %p143_p7 = scmp.lt.s32.totalorder %s1170_s17, 3 }
   0xe   : > { %s1453_s1 = sld [smem:[#allocation11_spill]]  ;;  %s1172_s28 = smov [#allocation5]  }
   0xf   : > { %p1254_p8 = pnand %p784_p5, %p143_p7  ;;  %s158_s29 = sshll.u32 %s1172_s28, 4  ;;  %s159_s29 = int_to_ptr.vmem [resolvable:$true] %s158_s29 }
  0x10   : > { %p787_p11 = scmp.ge.s32.totalorder %s1170_s17, 2  ;;  %s1447_s30 = smov 64  }
  0x11   : > { %p954_p9 = pneg %p1254_p8  ;;  %s1174_s4 = smov 4  }
  0x12   : > { %s32_s5 = sadd.s32 1, %s1166_s16  ;;  %s39_s6 = sadd.s32 1, %s1158_s14 }
  0x13   : > { %p955_p10 = pnand %p954_p9, %p1231_p1  ;;  %p34_p12 = scmp.ge.s32.totalorder %s32_s5, 2 }
  0x14   : > { %s156_s26 = sshll.u32 %s1453_s1, 4  ;;  %p46_p13 = scmp.ne.s32.totalorder %s1158_s14, %s1154_s13  ;;  %s157_s26 = int_to_ptr.hbm [resolvable:$true] %s156_s26 }
  0x15   : > { %957 = dma.hbm_to_vmem [thread:$0]  (!%p955_p10), %s157_s26, 1024, %s159_s29, [#allocation6], %s1447_s30, %s1447_s30, %s1174_s4  }
  0x16   : > { %p47_p0 = scmp.eq.s32.totalorder %s1170_s17, 0  ;;  %s1464_s5 = smov (%p34_p12, %s32_s5), 0 }
  0x17   : > { %p1279_p5 = por %p1235_p2, %p46_p13  ;;  %s36_s9 = ssub.s32 %s1166_s16, %s1464_s5 }
  0x18   : > { %p1273_p3 = por %p47_p0, %p46_p13  ;;  %p967_p7 = scmp.lt.s32.totalorder %s1170_s17, 2 }
  0x19   : > { %p37_p9 = scmp.eq.s32.totalorder %s36_s9, 0  ;;  %s178_s10 = sand.u32 1, %s1158_s14  }
  0x1a   : > { %s788_s11 = sshll.u32 %s178_s10, 7  ;;  %s896_s19 = sshll.u32 %s1166_s16, 7 }
  0x1b   : > { %s1288_s18 = scalar_select %p37_p9, %s1158_s14, %s39_s6  }
  0x1c   : > { %s187_s26 = scalar_lea.hbm %s1443_s0, %s896_s19  ;;  %s182_s28 = scalar_lea.vmem [#allocation2], %s788_s11 }
  0x1d   : > { %s190_s29 = sshll.u32 %s182_s28, 4  ;;  %s188_s21 = sshll.u32 %s187_s26, 4  ;;  %s191_s29 = int_to_ptr.vmem [resolvable:$true] %s190_s29  ;;  %s189_s21 = int_to_ptr.hbm [resolvable:$true] %s188_s21 }
  0x1e   : > { %p959_p2 = pnand %p967_p7, %p1273_p3  ;;  %s179_s30 = scalar_lea.sflag [#allocation3], %s178_s10 }
  0x1f   : > { %s1457_s1 = smov 64   ;;  %202 = sbr.rel (%p1254_p8) target bundleno = 270 (0x10e), region = 32 }
  0x20   : > { %961 = dma.hbm_to_vmem [thread:$0]  (!%p959_p2), %s189_s21, 2048, %s191_s29, %s179_s30, %s1457_s1, %s1457_s1, %s1174_s4  }
  0x21   : > { %s1302_s6 = sand.u32 (!%p1254_p8), 1, %s1154_s13  }
  0x22   : > { %s792_s9 = sshll.u32 (!%p1254_p8), %s1302_s6, 7  ;;  %s205_s11 = scalar_lea.sflag (!%p1254_p8), [#allocation3], %s1302_s6 }
  0x23   : > { %s1306_s19 = scalar_lea.vmem (!%p1254_p8), [#allocation2], %s792_s9 }
  0x24   : > { %1137 = dma.done.wait (%p1241_p4), %s205_s11, 2048  }
  0x25   : > { %1139 = vsyncadd (%p1241_p4), %s205_s11, 4294965248 }
  0x26   : > { %1141 = dma.done.wait (%p1231_p1), [#allocation6], 1024  }
  0x27   : > { %1143 = vsyncadd (%p1231_p1), [#allocation6], 4294966272  ;;  %v920_v0 = vld [vmem:[#allocation5 + $0x38] sm:$0xff]  ;;  %v919_v1 = vld [vmem:[#allocation5 + $0x30] sm:$0xff]  ;;  %s794_s22 = sshll.u32 %s1302_s6, 8  ;;  %s921_s30 = sshll.u32 %s1162_s15, 8 }
  0x28   : > { %441 = vmatpush.bf16.msra.mxu0 %v920_v0  ;;  %922 = vmatpush.bf16.msra.mxu1 %v920_v0  ;;  %v918_v2 = vld [vmem:[#allocation5 + $0x28] sm:$0xff]  ;;  %v917_v3 = vld [vmem:[#allocation5 + $0x20] sm:$0xff]  ;;  %v916_v4 = vld [vmem:[#allocation5 + $0x18] sm:$0xff]  ;;  %s1340_s27 = scalar_lea.vmem [#allocation7], %s794_s22  ;;  %s671_s15 = scalar_lea.hbm %s1446_s3, %s921_s30 }
  0x29   : > { %923 = vmatpush.bf16.msra.mxu2 %v920_v0  ;;  %924 = vmatpush.bf16.msra.mxu3 %v920_v0  ;;  %v915_v5 = vld [vmem:[#allocation5 + $0x10] sm:$0xff]  ;;  %v914_v6 = vld [vmem:[#allocation5 + $0x8] sm:$0xff]  ;;  %v913_v7 = vld [vmem:[#allocation5] sm:$0xff]  ;;  %s672_s10 = sshll.u32 %s1340_s27, 4  ;;  %s674_s24 = sshll.u32 %s671_s15, 4  ;;  %s673_s10 = int_to_ptr.vmem [resolvable:$true] %s672_s10  ;;  %s675_s24 = int_to_ptr.hbm [resolvable:$true] %s674_s24 }
  0x2a   : > { %v897_v8 = vld [vmem:[%s1306_s19] sm:$0xff]  ;;  %v898_v12 = vld [vmem:[%s1306_s19 + $0x8] sm:$0xff]  ;;  %v899_v16 = vld [vmem:[%s1306_s19 + $0x10] sm:$0xff]  ;;  %s659_s25 = scalar_lea.sflag [#allocation4], %s1302_s6  ;;  %s1098_s26 = sshra.s32 %s675_s24, 4  ;;  %s1099_s26 = int_to_ptr.hbm [resolvable:$true] %s1098_s26 }
  0x2b   : > { %v901_v9 = vld [vmem:[%s1306_s19 + $0x20] sm:$0xff]  ;;  %v902_v13 = vld [vmem:[%s1306_s19 + $0x28] sm:$0xff]  ;;  %v903_v17 = vld [vmem:[%s1306_s19 + $0x30] sm:$0xff]  ;;  %s1100_s28 = scalar_lea.hbm %s1099_s26, 256  ;;  %s1104_s9 = scalar_lea.hbm %s1446_s3, 512 }
  0x2c   : > { %442 = vmatpush.bf16.msra.mxu0 %v919_v1  ;;  %925 = vmatpush.bf16.msra.mxu1 %v919_v1  ;;  %v905_v10 = vld [vmem:[%s1306_s19 + $0x40] sm:$0xff]  ;;  %v906_v14 = vld [vmem:[%s1306_s19 + $0x48] sm:$0xff]  ;;  %v907_v18 = vld [vmem:[%s1306_s19 + $0x50] sm:$0xff]  ;;  %p1101_p1 = scmp.ne.s32.totalorder %s1099_s26, %s1100_s28  ;;  %p1105_p10 = scmp.lt.s32.totalorder %s1099_s26, %s1446_s3 }
  0x2d   : > { %926 = vmatpush.bf16.msra.mxu2 %v919_v1  ;;  %927 = vmatpush.bf16.msra.mxu3 %v919_v1  ;;  %v909_v11 = vld [vmem:[%s1306_s19 + $0x60] sm:$0xff]  ;;  %v910_v15 = vld [vmem:[%s1306_s19 + $0x68] sm:$0xff]  ;;  %v911_v19 = vld [vmem:[%s1306_s19 + $0x70] sm:$0xff]  ;;  %p1106_p12 = scmp.lt.s32.totalorder %s1104_s9, %s1100_s28 }
  0x2e   : > { %v900_v20 = vld [vmem:[%s1306_s19 + $0x18] sm:$0xff]  ;;  %v1335_v24 = vld [vmem:[%s1445_s2] ss:$0 sm:$0xff]  ;;  %p1102_p4 = pnand %p1101_p1, %p1279_p5 }
  0x2f   : > { %v904_v21 = vld [vmem:[%s1306_s19 + $0x38] sm:$0xff]  ;;  %p1107_p13 = por %p1106_p12, %p1105_p10 }
  0x30   : > { %443 = vmatpush.bf16.msra.mxu0 %v918_v2  ;;  %928 = vmatpush.bf16.msra.mxu1 %v918_v2  ;;  %v908_v22 = vld [vmem:[%s1306_s19 + $0x58] sm:$0xff]  ;;  %p1103_p8 = pneg %p1102_p4 }
  0x31   : > { %929 = vmatpush.bf16.msra.mxu2 %v918_v2  ;;  %930 = vmatpush.bf16.msra.mxu3 %v918_v2  ;;  %v912_v23 = vld [vmem:[%s1306_s19 + $0x78] sm:$0xff] }
  0x32   : > { %p1108_p0 = pnand %p1107_p13, %p1103_p8 }
  0x34   : > { %444 = vmatpush.bf16.msra.mxu0 %v917_v3  ;;  %931 = vmatpush.bf16.msra.mxu1 %v917_v3 }
  0x35   : > { %932 = vmatpush.bf16.msra.mxu2 %v917_v3  ;;  %933 = vmatpush.bf16.msra.mxu3 %v917_v3 }
  0x38   : > { %445 = vmatpush.bf16.msra.mxu0 %v916_v4  ;;  %934 = vmatpush.bf16.msra.mxu1 %v916_v4 }
  0x39   : > { %935 = vmatpush.bf16.msra.mxu2 %v916_v4  ;;  %936 = vmatpush.bf16.msra.mxu3 %v916_v4 }
  0x3c   : > { %446 = vmatpush.bf16.msra.mxu0 %v915_v5  ;;  %937 = vmatpush.bf16.msra.mxu1 %v915_v5 }
  0x3d   : > { %938 = vmatpush.bf16.msra.mxu2 %v915_v5  ;;  %939 = vmatpush.bf16.msra.mxu3 %v915_v5 }
  0x40   : > { %447 = vmatpush.bf16.msra.mxu0 %v914_v6  ;;  %940 = vmatpush.bf16.msra.mxu1 %v914_v6 }
  0x41   : > { %941 = vmatpush.bf16.msra.mxu2 %v914_v6  ;;  %942 = vmatpush.bf16.msra.mxu3 %v914_v6 }
  0x44   : > { %448 = vmatpush.bf16.msra.mxu0 %v913_v7  ;;  %943 = vmatpush.bf16.msra.mxu1 %v913_v7 }
  0x45   : > { %944 = vmatpush.bf16.msra.mxu2 %v913_v7  ;;  %945 = vmatpush.bf16.msra.mxu3 %v913_v7 }
  0x47   : > { %449 = vmatmul.bf16.vlgmr.msra.gmra.mxu0 %v897_v8  ;;  %469 = vmatmul.bf16.vlgmr.msra.gmra.mxu1 %v901_v9 }
  0x48   : > { %489 = vmatmul.bf16.vlgmr.msra.gmra.mxu2 %v905_v10  ;;  %509 = vmatmul.bf16.vlgmr.msra.gmra.mxu3 %v909_v11 }
  0x57   : > { %454 = vmatmul.bf16.gmra.mxu0 %v898_v12  ;;  %474 = vmatmul.bf16.gmra.mxu1 %v902_v13 }
  0x58   : > { %494 = vmatmul.bf16.gmra.mxu2 %v906_v14  ;;  %514 = vmatmul.bf16.gmra.mxu3 %v910_v15 }
  0x67   : > { %459 = vmatmul.bf16.gmra.mxu0 %v899_v16  ;;  %479 = vmatmul.bf16.gmra.mxu1 %v903_v17 }
  0x68   : > { %499 = vmatmul.bf16.gmra.mxu2 %v907_v18  ;;  %519 = vmatmul.bf16.gmra.mxu3 %v911_v19 }
  0x77   : > { %464 = vmatmul.bf16.gmra.mxu0 %v900_v20  ;;  %484 = vmatmul.bf16.gmra.mxu1 %v904_v21 }
  0x78   : > { %504 = vmatmul.bf16.gmra.mxu2 %v908_v22  ;;  %524 = vmatmul.bf16.gmra.mxu3 %v912_v23 }
  0xc4   : > { %v450_v25 = vpop.f32.mrf.mxu0  ;;  %v470_v26 = vpop.f32.mrf.mxu1 }
  0xc5   : > { %v451_v27 = vadd.f32 %v1335_v24, %v450_v25  ;;  %v471_v28 = vadd.f32 %v1335_v24, %v470_v26 }
  0xc7   : > { %vm530_vm0 = vcmp.ge.f32.partialorder %v451_v27, 0.0  ;;  %v562_v29 = vmul.f32 0.01, %v451_v27  ;;  %vm538_vm1 = vcmp.ge.f32.partialorder %v471_v28, 0.0  ;;  %v570_v30 = vmul.f32 0.01, %v471_v28 }
  0xc9   : > { %v594_v31 = vsel %vm530_vm0, %v451_v27, %v562_v29  ;;  %v602_v32 = vsel %vm538_vm1, %v471_v28, %v570_v30 }
  0xca   : > { %626 = vst [vmem:[%s1340_s27] sm:$0xff] %v594_v31 }
  0xcb   : > { %634 = vst [vmem:[%s1340_s27 + $0x40] sm:$0xff] %v602_v32  ;;  %v490_v33 = vpop.f32.mrf.mxu2  ;;  %v510_v34 = vpop.f32.mrf.mxu3 }
  0xcc   : > { %v491_v35 = vadd.f32 %v1335_v24, %v490_v33  ;;  %v511_v36 = vadd.f32 %v1335_v24, %v510_v34  ;;  %v452_v37 = vpop.f32.mrf.mxu0  ;;  %v472_v38 = vpop.f32.mrf.mxu1 }
  0xcd   : > { %v453_v39 = vadd.f32 %v1335_v24, %v452_v37  ;;  %v473_v40 = vadd.f32 %v1335_v24, %v472_v38 }
  0xce   : > { %vm546_vm2 = vcmp.ge.f32.partialorder %v491_v35, 0.0  ;;  %v578_v41 = vmul.f32 0.01, %v491_v35  ;;  %vm554_vm3 = vcmp.ge.f32.partialorder %v511_v36, 0.0  ;;  %v586_v42 = vmul.f32 0.01, %v511_v36 }
  0xcf   : > { %vm531_vm4 = vcmp.ge.f32.partialorder %v453_v39, 0.0  ;;  %v563_v43 = vmul.f32 0.01, %v453_v39  ;;  %vm539_vm5 = vcmp.ge.f32.partialorder %v473_v40, 0.0  ;;  %v571_v44 = vmul.f32 0.01, %v473_v40 }
  0xd0   : > { %v610_v45 = vsel %vm546_vm2, %v491_v35, %v578_v41  ;;  %v618_v46 = vsel %vm554_vm3, %v511_v36, %v586_v42 }
  0xd1   : > { %642 = vst [vmem:[%s1340_s27 + $0x80] sm:$0xff] %v610_v45  ;;  %v595_v47 = vsel %vm531_vm4, %v453_v39, %v563_v43  ;;  %v603_v48 = vsel %vm539_vm5, %v473_v40, %v571_v44 }
  0xd2   : > { %650 = vst [vmem:[%s1340_s27 + $0xc0] sm:$0xff] %v618_v46 }
  0xd3   : > { %627 = vst [vmem:[%s1340_s27 + $0x8] sm:$0xff] %v595_v47  ;;  %v492_v49 = vpop.f32.mrf.mxu2  ;;  %v512_v50 = vpop.f32.mrf.mxu3 }
  0xd4   : > { %635 = vst [vmem:[%s1340_s27 + $0x48] sm:$0xff] %v603_v48  ;;  %v493_v51 = vadd.f32 %v1335_v24, %v492_v49  ;;  %v513_v52 = vadd.f32 %v1335_v24, %v512_v50  ;;  %v455_v53 = vpop.f32.mrf.mxu0  ;;  %v475_v54 = vpop.f32.mrf.mxu1 }
  0xd5   : > { %v456_v55 = vadd.f32 %v1335_v24, %v455_v53  ;;  %v476_v56 = vadd.f32 %v1335_v24, %v475_v54 }
  0xd6   : > { %vm547_vm6 = vcmp.ge.f32.partialorder %v493_v51, 0.0  ;;  %v579_v57 = vmul.f32 0.01, %v493_v51  ;;  %vm555_vm7 = vcmp.ge.f32.partialorder %v513_v52, 0.0  ;;  %v587_v58 = vmul.f32 0.01, %v513_v52 }
  0xd7   : > { %vm532_vm8 = vcmp.ge.f32.partialorder %v456_v55, 0.0  ;;  %v564_v59 = vmul.f32 0.01, %v456_v55  ;;  %vm540_vm9 = vcmp.ge.f32.partialorder %v476_v56, 0.0  ;;  %v572_v60 = vmul.f32 0.01, %v476_v56 }
  0xd8   : > { %v611_v61 = vsel %vm547_vm6, %v493_v51, %v579_v57  ;;  %v619_v62 = vsel %vm555_vm7, %v513_v52, %v587_v58 }
  0xd9   : > { %643 = vst [vmem:[%s1340_s27 + $0x88] sm:$0xff] %v611_v61  ;;  %v596_v63 = vsel %vm532_vm8, %v456_v55, %v564_v59  ;;  %v604_v0 = vsel %vm540_vm9, %v476_v56, %v572_v60 }
  0xda   : > { %651 = vst [vmem:[%s1340_s27 + $0xc8] sm:$0xff] %v619_v62 }
  0xdb   : > { %628 = vst [vmem:[%s1340_s27 + $0x10] sm:$0xff] %v596_v63  ;;  %v495_v1 = vpop.f32.mrf.mxu2  ;;  %v515_v2 = vpop.f32.mrf.mxu3 }
  0xdc   : > { %636 = vst [vmem:[%s1340_s27 + $0x50] sm:$0xff] %v604_v0  ;;  %v496_v3 = vadd.f32 %v1335_v24, %v495_v1  ;;  %v516_v4 = vadd.f32 %v1335_v24, %v515_v2  ;;  %v457_v5 = vpop.f32.mrf.mxu0  ;;  %v477_v6 = vpop.f32.mrf.mxu1 }
  0xdd   : > { %v458_v7 = vadd.f32 %v1335_v24, %v457_v5  ;;  %v478_v8 = vadd.f32 %v1335_v24, %v477_v6 }
  0xde   : > { %vm548_vm10 = vcmp.ge.f32.partialorder %v496_v3, 0.0  ;;  %v580_v9 = vmul.f32 0.01, %v496_v3  ;;  %vm556_vm11 = vcmp.ge.f32.partialorder %v516_v4, 0.0  ;;  %v588_v10 = vmul.f32 0.01, %v516_v4 }
  0xdf   : > { %vm533_vm12 = vcmp.ge.f32.partialorder %v458_v7, 0.0  ;;  %v565_v11 = vmul.f32 0.01, %v458_v7  ;;  %vm541_vm13 = vcmp.ge.f32.partialorder %v478_v8, 0.0  ;;  %v573_v12 = vmul.f32 0.01, %v478_v8 }
  0xe0   : > { %v612_v13 = vsel %vm548_vm10, %v496_v3, %v580_v9  ;;  %v620_v14 = vsel %vm556_vm11, %v516_v4, %v588_v10 }
  0xe1   : > { %644 = vst [vmem:[%s1340_s27 + $0x90] sm:$0xff] %v612_v13  ;;  %v597_v15 = vsel %vm533_vm12, %v458_v7, %v565_v11  ;;  %v605_v16 = vsel %vm541_vm13, %v478_v8, %v573_v12 }
  0xe2   : > { %652 = vst [vmem:[%s1340_s27 + $0xd0] sm:$0xff] %v620_v14 }
  0xe3   : > { %629 = vst [vmem:[%s1340_s27 + $0x18] sm:$0xff] %v597_v15  ;;  %v497_v17 = vpop.f32.mrf.mxu2  ;;  %v517_v18 = vpop.f32.mrf.mxu3 }
  0xe4   : > { %637 = vst [vmem:[%s1340_s27 + $0x58] sm:$0xff] %v605_v16  ;;  %v498_v19 = vadd.f32 %v1335_v24, %v497_v17  ;;  %v518_v20 = vadd.f32 %v1335_v24, %v517_v18  ;;  %v460_v21 = vpop.f32.mrf.mxu0  ;;  %v480_v22 = vpop.f32.mrf.mxu1 }
  0xe5   : > { %v461_v23 = vadd.f32 %v1335_v24, %v460_v21  ;;  %v481_v25 = vadd.f32 %v1335_v24, %v480_v22 }
  0xe6   : > { %vm549_vm14 = vcmp.ge.f32.partialorder %v498_v19, 0.0  ;;  %v581_v26 = vmul.f32 0.01, %v498_v19  ;;  %vm557_vm15 = vcmp.ge.f32.partialorder %v518_v20, 0.0  ;;  %v589_v27 = vmul.f32 0.01, %v518_v20 }
  0xe7   : > { %vm534_vm0 = vcmp.ge.f32.partialorder %v461_v23, 0.0  ;;  %v566_v28 = vmul.f32 0.01, %v461_v23  ;;  %vm542_vm1 = vcmp.ge.f32.partialorder %v481_v25, 0.0  ;;  %v574_v29 = vmul.f32 0.01, %v481_v25 }
  0xe8   : > { %v613_v30 = vsel %vm549_vm14, %v498_v19, %v581_v26  ;;  %v621_v31 = vsel %vm557_vm15, %v518_v20, %v589_v27 }
  0xe9   : > { %645 = vst [vmem:[%s1340_s27 + $0x98] sm:$0xff] %v613_v30  ;;  %v598_v32 = vsel %vm534_vm0, %v461_v23, %v566_v28  ;;  %v606_v33 = vsel %vm542_vm1, %v481_v25, %v574_v29 }
  0xea   : > { %653 = vst [vmem:[%s1340_s27 + $0xd8] sm:$0xff] %v621_v31 }
  0xeb   : > { %630 = vst [vmem:[%s1340_s27 + $0x20] sm:$0xff] %v598_v32  ;;  %v500_v34 = vpop.f32.mrf.mxu2  ;;  %v520_v35 = vpop.f32.mrf.mxu3 }
  0xec   : > { %638 = vst [vmem:[%s1340_s27 + $0x60] sm:$0xff] %v606_v33  ;;  %v501_v36 = vadd.f32 %v1335_v24, %v500_v34  ;;  %v521_v37 = vadd.f32 %v1335_v24, %v520_v35  ;;  %v462_v38 = vpop.f32.mrf.mxu0  ;;  %v482_v39 = vpop.f32.mrf.mxu1 }
  0xed   : > { %v463_v40 = vadd.f32 %v1335_v24, %v462_v38  ;;  %v483_v41 = vadd.f32 %v1335_v24, %v482_v39 }
  0xee   : > { %vm550_vm2 = vcmp.ge.f32.partialorder %v501_v36, 0.0  ;;  %v582_v42 = vmul.f32 0.01, %v501_v36  ;;  %vm558_vm3 = vcmp.ge.f32.partialorder %v521_v37, 0.0  ;;  %v590_v43 = vmul.f32 0.01, %v521_v37 }
  0xef   : > { %vm535_vm4 = vcmp.ge.f32.partialorder %v463_v40, 0.0  ;;  %v567_v44 = vmul.f32 0.01, %v463_v40  ;;  %vm543_vm5 = vcmp.ge.f32.partialorder %v483_v41, 0.0  ;;  %v575_v45 = vmul.f32 0.01, %v483_v41 }
  0xf0   : > { %v614_v46 = vsel %vm550_vm2, %v501_v36, %v582_v42  ;;  %v622_v47 = vsel %vm558_vm3, %v521_v37, %v590_v43 }
  0xf1   : > { %646 = vst [vmem:[%s1340_s27 + $0xa0] sm:$0xff] %v614_v46  ;;  %v599_v48 = vsel %vm535_vm4, %v463_v40, %v567_v44  ;;  %v607_v49 = vsel %vm543_vm5, %v483_v41, %v575_v45 }
  0xf2   : > { %654 = vst [vmem:[%s1340_s27 + $0xe0] sm:$0xff] %v622_v47 }
  0xf3   : > { %631 = vst [vmem:[%s1340_s27 + $0x28] sm:$0xff] %v599_v48  ;;  %v502_v50 = vpop.f32.mrf.mxu2  ;;  %v522_v51 = vpop.f32.mrf.mxu3 }
  0xf4   : > { %639 = vst [vmem:[%s1340_s27 + $0x68] sm:$0xff] %v607_v49  ;;  %v503_v52 = vadd.f32 %v1335_v24, %v502_v50  ;;  %v523_v53 = vadd.f32 %v1335_v24, %v522_v51  ;;  %v465_v54 = vpop.f32.mrf.mxu0  ;;  %v485_v55 = vpop.f32.mrf.mxu1 }
  0xf5   : > { %v466_v56 = vadd.f32 %v1335_v24, %v465_v54  ;;  %v486_v57 = vadd.f32 %v1335_v24, %v485_v55 }
  0xf6   : > { %vm551_vm6 = vcmp.ge.f32.partialorder %v503_v52, 0.0  ;;  %v583_v58 = vmul.f32 0.01, %v503_v52  ;;  %vm559_vm7 = vcmp.ge.f32.partialorder %v523_v53, 0.0  ;;  %v591_v59 = vmul.f32 0.01, %v523_v53 }
  0xf7   : > { %vm536_vm8 = vcmp.ge.f32.partialorder %v466_v56, 0.0  ;;  %v568_v60 = vmul.f32 0.01, %v466_v56  ;;  %vm544_vm9 = vcmp.ge.f32.partialorder %v486_v57, 0.0  ;;  %v576_v61 = vmul.f32 0.01, %v486_v57 }
  0xf8   : > { %v615_v62 = vsel %vm551_vm6, %v503_v52, %v583_v58  ;;  %v623_v63 = vsel %vm559_vm7, %v523_v53, %v591_v59 }
  0xf9   : > { %647 = vst [vmem:[%s1340_s27 + $0xa8] sm:$0xff] %v615_v62  ;;  %v600_v0 = vsel %vm536_vm8, %v466_v56, %v568_v60  ;;  %v608_v1 = vsel %vm544_vm9, %v486_v57, %v576_v61 }
  0xfa   : > { %655 = vst [vmem:[%s1340_s27 + $0xe8] sm:$0xff] %v623_v63 }
  0xfb   : > { %632 = vst [vmem:[%s1340_s27 + $0x30] sm:$0xff] %v600_v0  ;;  %v505_v2 = vpop.f32.mrf.mxu2  ;;  %v525_v3 = vpop.f32.mrf.mxu3 }
  0xfc   : > { %640 = vst [vmem:[%s1340_s27 + $0x70] sm:$0xff] %v608_v1  ;;  %v506_v4 = vadd.f32 %v1335_v24, %v505_v2  ;;  %v526_v5 = vadd.f32 %v1335_v24, %v525_v3  ;;  %v467_v6 = vpop.f32.mrf.mxu0  ;;  %v487_v7 = vpop.f32.mrf.mxu1 }
  0xfd   : > { %v468_v8 = vadd.f32 %v1335_v24, %v467_v6  ;;  %v488_v9 = vadd.f32 %v1335_v24, %v487_v7 }
  0xfe   : > { %vm552_vm10 = vcmp.ge.f32.partialorder %v506_v4, 0.0  ;;  %v584_v10 = vmul.f32 0.01, %v506_v4  ;;  %vm560_vm11 = vcmp.ge.f32.partialorder %v526_v5, 0.0  ;;  %v592_v11 = vmul.f32 0.01, %v526_v5 }
  0xff   : > { %vm537_vm12 = vcmp.ge.f32.partialorder %v468_v8, 0.0  ;;  %v569_v12 = vmul.f32 0.01, %v468_v8  ;;  %vm545_vm13 = vcmp.ge.f32.partialorder %v488_v9, 0.0  ;;  %v577_v13 = vmul.f32 0.01, %v488_v9 }
 0x100   : > { %v616_v14 = vsel %vm552_vm10, %v506_v4, %v584_v10  ;;  %v624_v15 = vsel %vm560_vm11, %v526_v5, %v592_v11 }
 0x101   : > { %648 = vst [vmem:[%s1340_s27 + $0xb0] sm:$0xff] %v616_v14  ;;  %v601_v16 = vsel %vm537_vm12, %v468_v8, %v569_v12  ;;  %v609_v17 = vsel %vm545_vm13, %v488_v9, %v577_v13 }
 0x102   : > { %656 = vst [vmem:[%s1340_s27 + $0xf0] sm:$0xff] %v624_v15 }
 0x103   : > { %633 = vst [vmem:[%s1340_s27 + $0x38] sm:$0xff] %v601_v16  ;;  %v507_v18 = vpop.f32.mrf.mxu2  ;;  %v527_v19 = vpop.f32.mrf.mxu3 }
 0x104   : > { %641 = vst [vmem:[%s1340_s27 + $0x78] sm:$0xff] %v609_v17  ;;  %v508_v20 = vadd.f32 %v1335_v24, %v507_v18  ;;  %v528_v21 = vadd.f32 %v1335_v24, %v527_v19 }
 0x106   : > { %vm553_vm14 = vcmp.ge.f32.partialorder %v508_v20, 0.0  ;;  %v585_v22 = vmul.f32 0.01, %v508_v20  ;;  %vm561_vm15 = vcmp.ge.f32.partialorder %v528_v21, 0.0  ;;  %v593_v23 = vmul.f32 0.01, %v528_v21 }
 0x108   : > { %v617_v25 = vsel %vm553_vm14, %v508_v20, %v585_v22  ;;  %v625_v26 = vsel %vm561_vm15, %v528_v21, %v593_v23 }
 0x109   : > { %649 = vst [vmem:[%s1340_s27 + $0xb8] sm:$0xff] %v617_v25 }
 0x10a   : > { %657 = vst [vmem:[%s1340_s27 + $0xf8] sm:$0xff] %v625_v26 }
 0x10b   : > { %1111 = shalt.err (!%p1108_p0)
}
 0x10c   : > { %s1175_s6 = smov 128   ;;  %s1176_s1 = smov 8  }
 0x10d   : > { %952 = dma.vmem_to_hbm [thread:$0]  (%p1279_p5), %s673_s10, 4096, %s675_s24, %s659_s25, %s1175_s6, %s1175_s6, %s1176_s1  }
 0x10e PF: > { %s689_s20 = sand.u32 1, %s1150_s12   ;;  %p963_p3 = pnand %p787_p11, %p1246_p6 }
 0x10f   : > { %s690_s22 = scalar_lea.sflag [#allocation4], %s689_s20 }
 0x110   : > { %p964_p7 = pneg %p963_p3 }
 0x112   : > { %1145 = dma.done.wait (%p964_p7), %s690_s22, 4096  }
 0x113   : > { %1147 = vsyncadd (%p964_p7), %s690_s22, 4294963200  ;;  %s20_s17 = sadd.s32 1, %s1170_s17   ;;  %s1458_s12 = smov %s1154_s13 }
 0x114   : > { %p17_p9 = scmp.ge.s32.totalorder %s20_s17, 4   ;;  %s1459_s13 = smov %s1158_s14 }
 0x115   : > { %s1460_s14 = smov %s1288_s18  ;;  %s1461_s15 = smov %s1166_s16 }
 0x116   : > { %s1462_s16 = smov %s1464_s5  ;;  %19 = sbr.rel (!%p17_p9) target bundleno = 9 (0x9), region = 85 }
 0x11b   :  { %696 = vsyncpa [#allocation3], 1 }
 0x11c   :  { %698 = vsyncpa [#allocation3 + $0x1], 1 }
 0x11d   :  { %699 = vsyncpa [#allocation6], 1 }
 0x11e   :  { %700 = vsyncpa [#allocation4], 1 }
 0x11f   :  { %702 = vsyncpa [#allocation4 + $0x1], 1 }

</bundles_post_ra>
